<compile_context>
chip_gen: v6e
topology: v6e:2x2x1
jax: 0.10.0
libtpu: 0.0.40
codegen_flags: <defaults>
</compile_context>

<pallas_src>
import jax
import jax.numpy as jnp
from jax.experimental import pallas as pl
from jax.experimental.pallas import tpu as pltpu


def _round_up(x, m):
    return ((x + m - 1) // m) * m


def _proj_kernel(x_ref, w_ref, b_ref, o_ref):
    # x_ref: (tm, K) bf16 patch rows; w_ref: (K, tn) bf16 projection;
    # b_ref: (1, tn) f32 bias; o_ref: (tm, tn) output tile (x.dtype).
    acc = jnp.dot(x_ref[...], w_ref[...], preferred_element_type=jnp.float32)
    o_ref[...] = (acc + b_ref[...]).astype(o_ref.dtype)


def patch_embedding(x, weight, bias, patch_size, *, tm=512, tn=512,
                    compute_dtype=jnp.bfloat16):
    """ViT patch embedding == Conv2d(k=s=P) then flatten(2).transpose(1, 2).

    x:      (B, C, H, W)        NCHW activations (PyTorch convention)
    weight: (embed_dim, C, P, P)
    bias:   (embed_dim,)
    returns (B, num_patches, embed_dim) in x.dtype

    Note: matmul operands are cast to `compute_dtype` (default bf16) for the
    MXU; accumulation and the bias epilogue stay f32.
    """
    B, C, H, W = x.shape
    P = patch_size
    nh, nw = H // P, W // P
    num_patches = nh * nw
    embed_dim = weight.shape[0]
    K = C * P * P
    M = B * num_patches

    cd_bytes = jnp.dtype(compute_dtype).itemsize
    out_bytes = jnp.dtype(x.dtype).itemsize

    # --- per-generation VMEM budget -----------------------------------------
    try:
        vmem_cap = int(pltpu.get_tpu_info().vmem_capacity_bytes)
    except Exception:  # pragma: no cover - conservative default (v7x)
        vmem_cap = 64 << 20
    budget = min(int(vmem_cap * 0.6), 48 << 20)

    # --- patch extraction (layout glue, one XLA transpose writing bf16) -----
    # Per-patch flatten order (C, Ph, Pw) matches Conv2d weight flattening.
    # TODO(synk): fuse the NCHW patch gather into the kernel (rectangular
    # (1, C, P, W) blocks + in-kernel relayout) to drop this extra HBM pass;
    # kept as XLA glue here for Mosaic-lowering robustness.
    patches = (
        x.astype(compute_dtype)
        .reshape(B, C, nh, P, nw, P)
        .transpose(0, 2, 4, 1, 3, 5)
        .reshape(M, K)
    )

    # --- decide resident-weight vs tiled-N -----------------------------------
    n_pad128 = _round_up(embed_dim, 128)
    resident_w_bytes = 2 * K * n_pad128 * cd_bytes  # conservative 2-buffer est.
    weight_resident = (
        resident_w_bytes
        + 2 * 64 * K * cd_bytes
        + 2 * 64 * n_pad128 * out_bytes
    ) <= budget

    if weight_resident:
        N_pad = n_pad128
        tn_eff = N_pad
    else:
        tn_eff = min(_round_up(max(tn, 128), 128), n_pad128)
        N_pad = _round_up(embed_dim, tn_eff)

    def step_vmem(tm_c):
        return (2 * tm_c * K * cd_bytes           # patch tiles (double-buffered)
                + 2 * K * tn_eff * cd_bytes        # weight buffer(s)
                + 2 * 8 * tn_eff * 4               # bias (sublane-padded)
                + 2 * tm_c * tn_eff * out_bytes)   # output tiles

    # --- row tile: as large as the budget allows, never larger than M -------
    tm_eff = _round_up(min(tm, max(M, 8)), 8)
    while tm_eff > 8 and step_vmem(tm_eff) > budget:
        tm_eff = max(8, _round_up(tm_eff // 2, 8))

    # v7x megacore: make sure there are at least 2 row tiles when M allows it.
    if -(-M // tm_eff) == 1 and M > 8:
        tm_eff = _round_up(-(-M // 2), 8)

    M_pad = _round_up(M, tm_eff)

    # --- operand prep (weight/bias are tiny; one-time per call) -------------
    if M_pad != M:
        patches = jnp.pad(patches, ((0, M_pad - M), (0, 0)))

    w2d = weight.reshape(embed_dim, K).T.astype(compute_dtype)  # (K, embed_dim)
    if N_pad != embed_dim:
        w2d = jnp.pad(w2d, ((0, 0), (0, N_pad - embed_dim)))

    b2d = bias.astype(jnp.float32).reshape(1, embed_dim)
    if N_pad != embed_dim:
        b2d = jnp.pad(b2d, ((0, 0), (0, N_pad - embed_dim)))

    # --- grid / specs ---------------------------------------------------------
    if weight_resident:
        grid = (M_pad // tm_eff,)
        in_specs = [
            pl.BlockSpec((tm_eff, K), lambda i: (i, 0)),
            pl.BlockSpec((K, N_pad), lambda i: (0, 0)),   # DMA'd once, resident
            pl.BlockSpec((1, N_pad), lambda i: (0, 0)),   # DMA'd once
        ]
        out_specs = pl.BlockSpec((tm_eff, N_pad), lambda i: (i, 0))
        dim_sem = ("parallel",)
        w_reads = 1
    else:
        grid = (M_pad // tm_eff, N_pad // tn_eff)
        in_specs = [
            pl.BlockSpec((tm_eff, K), lambda i, j: (i, 0)),
            pl.BlockSpec((K, tn_eff), lambda i, j: (0, j)),
            pl.BlockSpec((1, tn_eff), lambda i, j: (0, j)),
        ]
        out_specs = pl.BlockSpec((tm_eff, tn_eff), lambda i, j: (i, j))
        dim_sem = ("parallel", "parallel")
        w_reads = grid[0]

    vmem_limit = max(32 << 20,
                     min(int(step_vmem(tm_eff) * 1.4) + (2 << 20), vmem_cap))

    cost = pl.CostEstimate(
        flops=2 * M_pad * K * N_pad,
        transcendentals=0,
        bytes_accessed=(M_pad * K * cd_bytes            # patches read once
                        + w_reads * K * N_pad * cd_bytes  # weight read
                        + N_pad * 4                       # bias
                        + M_pad * N_pad * out_bytes),     # output write
    )

    out = pl.pallas_call(
        _proj_kernel,
        out_shape=jax.ShapeDtypeStruct((M_pad, N_pad), x.dtype),
        grid_spec=pltpu.PrefetchScalarGridSpec(
            num_scalar_prefetch=0,
            grid=grid,
            in_specs=in_specs,
            out_specs=out_specs,
        ),
        compiler_params=pltpu.CompilerParams(
            dimension_semantics=dim_sem,
            vmem_limit_bytes=vmem_limit,
        ),
        cost_estimate=cost,
    )(patches, w2d, b2d)

    return out[:M, :embed_dim].reshape(B, num_patches, embed_dim)


if __name__ == "__main__":
    # Small shapes consistent with the module: img_size=16, patch_size=4,
    # in_chans=4, embed_dim=32 -> num_patches = (16//4)^2 = 16.
    B, C, IMG, P, D = 2, 4, 16, 4, 32

    key = jax.random.PRNGKey(0)
    kx, kw, kb = jax.random.split(key, 3)
    x = jax.random.normal(kx, (B, C, IMG, IMG), dtype=jnp.float32)
    weight = jax.random.normal(kw, (D, C, P, P), dtype=jnp.float32) * 0.02
    bias = jax.random.normal(kb, (D,), dtype=jnp.float32) * 0.02

    out = patch_embedding(x, weight, bias, P)
    out = jax.block_until_ready(out)

    # Reference: plain-JAX patchify + f32 matmul (same math as Conv2d with
    # kernel=stride=patch_size followed by flatten(2).transpose(1, 2)).
    nh = IMG // P
    patches_ref = (
        x.reshape(B, C, nh, P, nh, P)
        .transpose(0, 2, 4, 1, 3, 5)
        .reshape(B, nh * nh, C * P * P)
    )
    ref = patches_ref @ weight.reshape(D, -1).T + bias
    assert out.shape == (B, nh * nh, D)
    # bf16 matmul operands with f32 accumulation -> relaxed tolerance vs f32.
    assert jnp.allclose(out, ref, atol=2e-2, rtol=2e-2), float(
        jnp.max(jnp.abs(out - ref)))

    print("KERNEL_OK")
</pallas_src>

<mosaic_0001>
module attributes {stable_mosaic.version = 11 : i64} {
  func.func @_proj_kernel(%arg0: i32, %arg1: memref<16x64xbf16, #tpu.memory_space<vmem>>, %arg2: memref<64x128xbf16, #tpu.memory_space<vmem>>, %arg3: memref<1x128xf32, #tpu.memory_space<vmem>>, %arg4: memref<16x128xf32, #tpu.memory_space<vmem>>) attributes {dimension_semantics = [#tpu.dimension_semantics<parallel>], iteration_bounds = array<i64: 2>, scalar_prefetch = 0 : i64, scratch_operands = 0 : i64, tpu.core_type = #tpu.core_type<tc>, window_params = [{transform_indices = @transform_0, window_bounds = array<i64: 16, 64>}, {pipeline_mode = #tpu.pipeline_mode<synchronous>, transform_indices = @transform_1, window_bounds = array<i64: 64, 128>}, {pipeline_mode = #tpu.pipeline_mode<synchronous>, transform_indices = @transform_2, window_bounds = array<i64: 1, 128>}, {transform_indices = @transform_3, window_bounds = array<i64: 16, 128>}]} {
    %c0 = arith.constant 0 : index
    %c0_0 = arith.constant 0 : index
    %0 = vector.load %arg1[%c0, %c0_0] : memref<16x64xbf16, #tpu.memory_space<vmem>>, vector<16x64xbf16>
    %c0_1 = arith.constant 0 : index
    %c0_2 = arith.constant 0 : index
    %1 = vector.load %arg2[%c0_1, %c0_2] : memref<64x128xbf16, #tpu.memory_space<vmem>>, vector<64x128xbf16>
    %cst = arith.constant dense<0.000000e+00> : vector<16x128xf32>
    %2 = tpu.matmul %0, %1, %cst {dimension_numbers = #tpu.dot_dimension_numbers<[1], [0], [0], [1], [0, 0, 1, 1], [], []>} : vector<16x64xbf16>, vector<64x128xbf16>, vector<16x128xf32> -> vector<16x128xf32>
    %c0_3 = arith.constant 0 : index
    %c0_4 = arith.constant 0 : index
    %3 = vector.load %arg3[%c0_3, %c0_4] : memref<1x128xf32, #tpu.memory_space<vmem>>, vector<1x128xf32>
    %4 = vector.broadcast %3 : vector<1x128xf32> to vector<16x128xf32>
    %5 = arith.addf %2, %4 : vector<16x128xf32>
    %c0_5 = arith.constant 0 : index
    %c0_6 = arith.constant 0 : index
    %6 = vector.load %arg4[%c0_5, %c0_6] : memref<16x128xf32, #tpu.memory_space<vmem>>, vector<16x128xf32>
    tpu.vector_store %arg4[%c0_5, %c0_6], %5 {strides = array<i32>} : memref<16x128xf32, #tpu.memory_space<vmem>>, vector<16x128xf32>,
    return
  }
  func.func @transform_0(%arg0: i32) -> (i32, i32) {
    %c0_i32 = arith.constant 0 : i32
    %c0_i32_0 = arith.constant 0 : i32
    return %arg0, %c0_i32 : i32, i32
  }
  func.func @transform_1(%arg0: i32) -> (i32, i32) {
    %c0_i32 = arith.constant 0 : i32
    %c0_i32_0 = arith.constant 0 : i32
    %c0_i32_1 = arith.constant 0 : i32
    return %c0_i32, %c0_i32_0 : i32, i32
  }
  func.func @transform_2(%arg0: i32) -> (i32, i32) {
    %c0_i32 = arith.constant 0 : i32
    %c0_i32_0 = arith.constant 0 : i32
    %c0_i32_1 = arith.constant 0 : i32
    return %c0_i32, %c0_i32_0 : i32, i32
  }
  func.func @transform_3(%arg0: i32) -> (i32, i32) {
    %c0_i32 = arith.constant 0 : i32
    %c0_i32_0 = arith.constant 0 : i32
    return %arg0, %c0_i32 : i32, i32
  }
}

</mosaic_0001>

<bundles_post_ra>
// kernel: tpu_custom_call.1
= control target key start
LH: loop header
LB: loop body
LE: loop exit
PB: predicated region body
PF: predicated region fallthrough
CT: control target
= control target key end

     0   :  { %8 = vsyncpa [#allocation3], 0  ;;  %s847_s0 = inlined_call_operand.hbm [shape: bf16[32,64], index: 0, kind: input, shape index: {}]   ;;  %s848_s1 = inlined_call_operand.hbm [shape: bf16[64,128], index: 1, kind: input, shape index: {}]   ;;  %s849_s2 = inlined_call_operand.vmem [shape: f32[1,128], index: 2, kind: input, shape index: {}]   ;;  %s850_s3 = inlined_call_operand.hbm [shape: f32[32,128], index: 3, kind: output, shape index: {}]  }
   0x1   :  { %10 = vsyncpa [#allocation3 + $0x1], 0 }
   0x2   :  { %11 = vsyncpa [#allocation6], 0 }
   0x3   :  { %12 = vsyncpa [#allocation4], 0 }
   0x4   :  { %14 = vsyncpa [#allocation4 + $0x1], 0  ;;  %s660_s12 = smov 0   ;;  %s662_s13 = smov 0  }
   0x5   :  { %s664_s14 = smov 0   ;;  %s666_s15 = smov 0  }
   0x6 LB: > { %s681_s16 = sadd.s32 4294967295, %s629_s15   ;;  %s397_s17 = sadd.s32 4294967294, %s629_s15   ;;  %s629_s15 = sphi %s666_s15, %s872_s15   ;;  %s625_s14 = sphi %s664_s14, %s871_s14   ;;  %s621_s13 = sphi %s662_s13, %s870_s13   ;;  %s617_s12 = sphi %s660_s12, %s869_s12  }
   0x7   : > { %p40_p0 = scmp.ne.s32.totalorder %s621_s13, %s617_s12  ;;  %p851_p1 = scmp.eq.s32.totalorder %s681_s16, 0 }
   0x8   : > { %p112_p3 = scmp.eq.s32.totalorder %s397_s17, 1  ;;  %p398_p5 = scmp.ge.s32.totalorder %s629_s15, 1 }
   0x9   : > { %p690_p4 = por %p851_p1, %p40_p0  ;;  %p119_p7 = scmp.lt.s32.totalorder %s629_s15, 3 }
   0xa   : > { %p695_p6 = por %p112_p3, %p40_p0  ;;  %s631_s21 = smov [#allocation5]  }
   0xb   : > { %s855_s18 = scalar_select %p690_p4, 1, 0 }
   0xc   : > { %s856_s19 = scalar_select %p695_p6, 1, 0 }
   0xd   : > { %p700_p8 = pnand %p398_p5, %p119_p7  ;;  %s131_s22 = sshll.u32 %s631_s21, 4  ;;  %s132_s22 = int_to_ptr.vmem [resolvable:$true] %s131_s22 }
   0xe   : > { %s714_s24 = sadd.s32 1, %s629_s15   ;;  %s27_s25 = sadd.s32 1, %s625_s14 }
   0xf   : > { %s857_s20 = scalar_select %p700_p8, 1, 0 }
  0x10   : > { %p447_p9 = pneg %p700_p8  ;;  %s24_s26 = ssub.s32 %s629_s15, %s714_s24 }
  0x11   : > { %s518_s27 = scalar_lea.vmem %s132_s22, 512  ;;  %p526_p5 = scmp.lt.s32.totalorder %s132_s22, %s132_s22 }
  0x12   : > { %p709_p11 = pnand %p447_p9, %p851_p1  ;;  %p519_p13 = scmp.ne.s32.totalorder %s132_s22, %s518_s27 }
  0x13   : > { %p527_p7 = scmp.lt.s32.totalorder %s518_s27, %s518_s27 }
  0x14   : > { %p509_p12 = pneg %p709_p11 }
  0x15   : > { %p528_p10 = por %p527_p7, %p526_p5 }
  0x16   : > { %p521_p0 = pnand %p519_p13, %p509_p12 }
  0x18   : > { %p522_p3 = pneg %p521_p0 }
  0x1a   : > { %p529_p2 = pnand %p528_p10, %p522_p3 }
  0x1c   : > { %532 = shalt.err (!%p529_p2)
}
  0x1d   : > { %s632_s28 = smov 64   ;;  %s633_s29 = smov 4  }
  0x1e   : > { %450 = dma.hbm_to_vmem [thread:$0]  (!%p709_p11), %s848_s1, 512, %s132_s22, [#allocation6], %s632_s28, %s632_s28, %s633_s29  }
  0x1f   : > { %p25_p2 = scmp.eq.s32.totalorder %s24_s26, 0  ;;  %p34_p9 = scmp.ne.s32.totalorder %s625_s14, %s621_s13 }
  0x20   : > { %p35_p10 = scmp.eq.s32.totalorder %s629_s15, 0  ;;  %p460_p12 = scmp.lt.s32.totalorder %s629_s15, 2 }
  0x21   : > { %s734_s5 = scalar_select %p25_p2, %s625_s14, %s27_s25  }
  0x22   : > { %p36_p13 = por %p35_p10, %p34_p9  ;;  %p859_p0 = scmp.eq.s32.totalorder %s681_s16, 1 }
  0x23   : > { %s148_s7 = sand.u32 1, %s625_s14   ;;  %s420_s8 = sshll.u32 %s629_s15, 7 }
  0x24   : > { %p738_p3 = por %p859_p0, %p34_p9  ;;  %s401_s9 = sshll.u32 %s148_s7, 3 }
  0x25   : > { %s747_s17 = scalar_lea.hbm %s847_s0, %s420_s8  ;;  %s152_s21 = scalar_lea.vmem [#allocation2], %s401_s9 }
  0x26   : > { %s860_s6 = scalar_select %p738_p3, 1, 0 }
  0x27   : > { %s159_s22 = sshll.u32 %s152_s21, 4  ;;  %p749_p11 = pnand %p460_p12, %p36_p13  ;;  %s753_s22 = int_to_ptr.vmem [resolvable:$true] %s159_s22 }
  0x28   : > { %s755_s25 = scalar_lea.sflag [#allocation3], %s148_s7  ;;  %s533_s26 = scalar_lea.hbm %s747_s17, 128 }
  0x29   : > { %p534_p5 = scmp.ne.s32.totalorder %s747_s17, %s533_s26  ;;  %p535_p7 = pneg %p749_p11 }
  0x2a   : > { %s538_s4 = scalar_lea.hbm %s847_s0, 256  ;;  %p539_p10 = scmp.lt.s32.totalorder %s747_s17, %s847_s0 }
  0x2b   : > { %p536_p2 = pnand %p535_p7, %p534_p5  ;;  %p540_p12 = scmp.lt.s32.totalorder %s538_s4, %s533_s26 }
  0x2d   : > { %p537_p9 = pneg %p536_p2  ;;  %p541_p13 = por %p540_p12, %p539_p10 }
  0x2f   : > { %p542_p0 = pnand %p541_p13, %p537_p9 }
  0x31   : > { %545 = shalt.err (!%p542_p0)
}
  0x32   : > { %s546_s7 = scalar_lea.vmem %s753_s22, 128  ;;  %s634_s10 = smov [#allocation2]  }
  0x33   : > { %p547_p1 = scmp.ne.s32.totalorder %s753_s22, %s546_s7  ;;  %s551_s11 = sshll.u32 %s634_s10, 4  ;;  %s552_s11 = int_to_ptr.vmem [resolvable:$false] %s551_s11 }
  0x34   : > { %s553_s21 = scalar_lea.vmem %s552_s11, 256  ;;  %p554_p2 = scmp.lt.s32.totalorder %s753_s22, %s552_s11 }
  0x35   : > { %p549_p6 = pnand %p547_p1, %p535_p7  ;;  %p555_p3 = scmp.lt.s32.totalorder %s553_s21, %s546_s7 }
  0x37   : > { %p550_p5 = pneg %p549_p6  ;;  %p556_p4 = por %p555_p3, %p554_p2 }
  0x39   : > { %p557_p8 = pnand %p556_p4, %p550_p5 }
  0x3b   : > { %560 = shalt.err (!%p557_p8)
}
  0x3c   : > { %454 = dma.hbm_to_vmem [thread:$0]  (!%p749_p11), %s747_s17, 128, %s753_s22, %s755_s25, %s632_s28, %s632_s28, %s633_s29  }
  0x3d   : > { %p862_p1 = scmp.ne.s32.totalorder %s857_s20, 0 }
  0x3e   : > { %s782_s26 = sand.u32 (!%p862_p1), 1, %s621_s13   ;;  %p863_p4 = scmp.ne.s32.totalorder (!%p862_p1), %s855_s18, 0 }
  0x3f   : > { %171 = sbr.rel (%p862_p1) target bundleno = 302 (0x12e), region = 32  ;;  %s405_s27 = sshll.u32 (!%p862_p1), %s782_s26, 3 }
  0x40   : > { %s174_s30 = scalar_lea.sflag (!%p862_p1), [#allocation3], %s782_s26  ;;  %s177_s4 = scalar_lea.vmem (!%p862_p1), [#allocation2], %s405_s27 }
  0x44   : > { %604 = dma.done.wait (%p863_p4), %s174_s30, 128  }
  0x45   : > { %606 = vsyncadd (%p863_p4), %s174_s30, 4294967168  ;;  %p864_p6 = scmp.eq.s32.totalorder %s681_s16, 0 }
  0x47   : > { %608 = dma.done.wait (%p864_p6), [#allocation6], 512   ;;  %p865_p8 = pmov %p864_p6 }
  0x48   : > { %v635_v0 = vmov 0.0   ;;  %vm636_vm0 = vmmov 0   ;;  %v502_v1 = vld [vmem:[#allocation5 + $0x18] sm:$0xff]   ;;  %v503_v2 = vld [vmem:[#allocation5 + $0x10] sm:$0xff]   ;;  %v504_v3 = vld [vmem:[#allocation5 + $0x8] sm:$0xff]   ;;  %vm253_vm1 = vcmask 523264  }
  0x49   : > { %610 = vsyncadd (%p865_p8), [#allocation6], 4294966784  ;;  %427 = vmatprep.subr.bf16.mxu0 %v635_v0  ;;  %435 = vmatprep.mubr.msk.bf16.mxu0 %vm636_vm0, %v635_v0  ;;  %v505_v4 = vld [vmem:[#allocation5] sm:$0xff]   ;;  %v506_v5 = vld [vmem:[%s177_s4] sm:$0xff]   ;;  %s407_s18 = sshll.u32 %s782_s26, 4  ;;  %s421_s22 = sshll.u32 %s681_s16, 8 }
  0x4a   : > { %428 = vmatpush3.bf16.msra.mxu0 %v502_v1  ;;  %v408_v6 = vld [vmem:[%s849_s2] ss:$0 sm:$0xff]  ;;  %s203_s29 = scalar_lea.vmem [#allocation7], %s407_s18  ;;  %s804_s8 = scalar_lea.hbm %s850_s3, %s421_s22 }
  0x4b   : > { %429 = vmatprep.subr.bf16.mxu0 %v635_v0  ;;  %s314_s17 = sshll.u32 %s203_s29, 4  ;;  %s301_s9 = scalar_lea.sflag [#allocation4], %s782_s26  ;;  %s799_s17 = int_to_ptr.vmem [resolvable:$true] %s314_s17 }
  0x4c   : > { %s561_s7 = scalar_lea.vmem %s799_s17, 256  ;;  %p866_p11 = scmp.ne.s32.totalorder %s860_s6, 0 }
  0x4d   : > { %p562_p3 = scmp.ne.s32.totalorder %s799_s17, %s561_s7  ;;  %s637_s16 = smov [#allocation7]  }
  0x4e   : > { %430 = vmatpush3.bf16.msra.mxu0 %v503_v2  ;;  %s565_s10 = sshll.u32 %s637_s16, 4  ;;  %s566_s10 = int_to_ptr.vmem [resolvable:$false] %s565_s10 }
  0x4f   : > { %431 = vmatprep.subr.bf16.mxu0 %v635_v0  ;;  %p563_p7 = pnand %p562_p3, %p866_p11  ;;  %s567_s11 = scalar_lea.vmem %s566_s10, 512 }
  0x50   : > { %p568_p10 = scmp.lt.s32.totalorder %s799_s17, %s566_s10  ;;  %p569_p12 = scmp.lt.s32.totalorder %s567_s11, %s561_s7 }
  0x51   : > { %p564_p9 = pneg %p563_p7 }
  0x52   : > { %432 = vmatpush3.bf16.msra.mxu0 %v504_v3  ;;  %p570_p13 = por %p569_p12, %p568_p10 }
  0x53   : > { %433 = vmatprep.subr.bf16.mxu0 %v635_v0 }
  0x54   : > { %p571_p0 = pnand %p570_p13, %p564_p9 }
  0x56   : > { %434 = vmatpush3.bf16.msra.mxu0 %v505_v4 }
  0x59   : > { %436 = vmatmul.mubr.msk.bf16.vlgmr.msra.gmra.mxu0 %vm253_vm1, %v506_v5 }
 0x119   : > { %v291_v7 = vpop.f32.mrf.mxu0 }
 0x11a   : > { %v292_v8 = vadd.f32 %v408_v6, %v291_v7 }
 0x11b   : > { %v437_v9 = vpop.f32.mrf.mxu0 }
 0x11c   : > { %298 = vst [vmem:[%s203_s29] sm:$0xff] %v292_v8 }
 0x11d   : > { %v294_v10 = vpop.f32.mrf.mxu0 }
 0x11e   : > { %v295_v11 = vadd.f32 %v408_v6, %v294_v10 }
 0x11f   : > { %v438_v12 = vpop.f32.mrf.mxu0 }
 0x120   : > { %299 = vst [vmem:[%s203_s29 + $0x8] sm:$0xff] %v295_v11 }
 0x121   : > { %574 = shalt.err (!%p571_p0)
}
 0x122   : > { %s575_s21 = scalar_lea.hbm %s804_s8, 256  ;;  %s579_s4 = scalar_lea.hbm %s850_s3, 512 }
 0x123   : > { %p576_p5 = scmp.ne.s32.totalorder %s804_s8, %s575_s21  ;;  %p580_p4 = scmp.lt.s32.totalorder %s804_s8, %s850_s3 }
 0x124   : > { %p581_p6 = scmp.lt.s32.totalorder %s579_s4, %s575_s21 }
 0x125   : > { %p577_p2 = pnand %p576_p5, %p866_p11 }
 0x126   : > { %p582_p8 = por %p581_p6, %p580_p4 }
 0x127   : > { %p578_p1 = pneg %p577_p2 }
 0x129   : > { %p583_p3 = pnand %p582_p8, %p578_p1 }
 0x12b   : > { %586 = shalt.err (!%p583_p3)
}
 0x12c   : > { %s638_s28 = smov 128   ;;  %s639_s29 = smov 8  }
 0x12d   : > { %445 = dma.vmem_to_hbm [thread:$0]  (%p866_p11), %s799_s17, 256, %s804_s8, %s301_s9, %s638_s28, %s638_s28, %s639_s29  }
 0x12e PF: > { %s329_s22 = sand.u32 1, %s617_s12   ;;  %p867_p7 = scmp.ne.s32.totalorder %s856_s19, 0 }
 0x12f   : > { %p868_p9 = scmp.ge.s32.totalorder %s629_s15, 2  ;;  %s330_s23 = scalar_lea.sflag [#allocation4], %s329_s22 }
 0x131   : > { %p456_p10 = pnand %p868_p9, %p867_p7 }
 0x133   : > { %p457_p12 = pneg %p456_p10 }
 0x135   : > { %612 = dma.done.wait (%p457_p12), %s330_s23, 256  }
 0x136   : > { %614 = vsyncadd (%p457_p12), %s330_s23, 4294967040  ;;  %p17_p13 = scmp.ge.s32.totalorder %s714_s24, 4   ;;  %s869_s12 = smov %s621_s13 }
 0x137   : > { %s870_s13 = smov %s625_s14  ;;  %s871_s14 = smov %s734_s5 }
 0x138   : > { %s872_s15 = smov %s714_s24  ;;  %19 = sbr.rel (!%p17_p13) target bundleno = 6 (0x6), region = 81 }
 0x13d   :  { %335 = vsyncpa [#allocation3], 1 }
 0x13e   :  { %337 = vsyncpa [#allocation3 + $0x1], 1 }
 0x13f   :  { %338 = vsyncpa [#allocation6], 1 }
 0x140   :  { %339 = vsyncpa [#allocation4], 1 }
 0x141   :  { %341 = vsyncpa [#allocation4 + $0x1], 1 }

</bundles_post_ra>
